<compile_context>
chip_gen: v6e
topology: v6e:2x2x1
jax: 0.10.0
libtpu: 0.0.40
codegen_flags: <defaults>
</compile_context>

<pallas_src>
import jax
import jax.numpy as jnp
from jax import lax
from jax.experimental import pallas as pl
from jax.experimental.pallas import tpu as pltpu

LRELU_SLOPE = 0.2   # nn.LeakyReLU(0.2)
IN_EPS = 1e-5       # nn.InstanceNorm2d default eps
H = W = 4           # first synthesis block is fixed 4x4
S = H * W


# ---------------------------------------------------------------------------
# Fused kernel (one grid step == one batch sample):
#   const+bias -> epilogue1 -> 3x3 conv (im2col matmul) -> epilogue2
# ---------------------------------------------------------------------------
def _input_block_kernel(const_ref, vecs_ref, noise_ref, dlat_ref,
                        wsty_ref, bsty_ref, wconv_ref, o_ref):
    """Per-step shapes:
      const: (S, C)              vecs: (4, C) = [const_bias, noise_w1, noise_w2, conv_b]
      noise: (2, 1, S, 1)        dlat: (1, 1, 2*D)
      wsty:  (2*D, 4*C) bf16 block-diag    bsty: (1, 4*C) f32
      wconv: (9*C, C) bf16, taps packed (kh, kw, Cin) -> rows
      out:   (1, S, C)
    """
    _S, C = const_ref.shape
    assert _S == S, "kernel hard-codes the 4x4 spatial grid of InputBlock"

    # ---- merged StyleMod linear: both epilogues in one bf16 MXU pass ----
    dlat = dlat_ref[...].reshape(1, -1).astype(jnp.bfloat16)          # (1, 2D)
    styles = jnp.dot(dlat, wsty_ref[...],
                     preferred_element_type=jnp.float32) + bsty_ref[...]
    scale1 = styles[:, 0 * C:1 * C]
    shift1 = styles[:, 1 * C:2 * C]
    scale2 = styles[:, 2 * C:3 * C]
    shift2 = styles[:, 3 * C:4 * C]

    vecs = vecs_ref[...]
    cbias, nw1, nw2, bconv = vecs[0:1], vecs[1:2], vecs[2:3], vecs[3:4]

    nz = noise_ref[...]              # (2, 1, S, 1)
    noise1 = nz[0, 0]                # (S, 1): lane-broadcast happens in the epilogue
    noise2 = nz[1, 0]

    inv_s = 1.0 / S

    def epilogue(x, noise, nw, scale, shift):
        # NoiseLayer: per-pixel noise (constant over channels) * per-channel weight
        y = x + nw * noise
        # LeakyReLU(0.2)
        y = jnp.where(y >= 0.0, y, LRELU_SLOPE * y)
        # InstanceNorm2d (affine=False, biased variance) -- fused one-pass statistics
        mean = jnp.sum(y, axis=0, keepdims=True) * inv_s
        ex2 = jnp.sum(y * y, axis=0, keepdims=True) * inv_s
        var = ex2 - mean * mean
        y = (y - mean) * lax.rsqrt(var + IN_EPS)
        # StyleMod: x * (scale + 1) + shift
        return y * (scale + 1.0) + shift

    # ---- const input + bias, epilogue 1 ----
    y = epilogue(const_ref[...] + cbias, noise1, nw1, scale1, shift1)   # (S, C) f32

    # ---- 3x3 'same' conv as ONE im2col matmul (9 rolled+masked windows) ----
    # Boundary masks are static for the 4x4 image; hoisted out of the tap loop.
    s_idx = lax.broadcasted_iota(jnp.int32, (S, 1), 0)
    hh = s_idx >> 2                  # spatial row = s // 4
    ww = s_idx & 3                   # spatial col = s %  4
    row_m = (hh >= 1, None, hh <= 2)
    col_m = (ww >= 1, None, ww <= 2)

    windows = []
    for i in range(3):               # kernel row (kh)
        for j in range(3):           # kernel col (kw)
            d = (i - 1) * W + (j - 1)            # flat spatial shift of this tap
            win = y if d == 0 else pltpu.roll(y, shift=(-d) % S, axis=0)
            m = row_m[i]
            if col_m[j] is not None:
                m = col_m[j] if m is None else (m & col_m[j])
            if m is not None:
                win = jnp.where(m, win, 0.0)     # zero taps falling off the 4x4 image
            windows.append(win)
    xcol = jnp.concatenate(windows, axis=-1).astype(jnp.bfloat16)      # (S, 9*C)
    z = jnp.dot(xcol, wconv_ref[...],
                preferred_element_type=jnp.float32) + bconv            # (S, C) f32

    # ---- epilogue 2 and store ----
    o_ref[0] = epilogue(z, noise2, nw2, scale2, shift2)


# ---------------------------------------------------------------------------
# Parameter init (deterministic; mirrors the PyTorch __init__, pre-packed for
# the fused kernel's layouts; matmul weights stored in bf16)
# ---------------------------------------------------------------------------
def init_params(key, nf, dlatent_size):
    k_s1, k_s2, k_conv = jax.random.split(key, 3)
    gain = 2.0 ** 0.5
    D = dlatent_size

    # const input (1, nf, 4, 4) of ones -> channels-last (S, nf); bias ones
    const_sc = jnp.ones((S, nf), jnp.float32)
    cbias = jnp.ones((nf,), jnp.float32)
    # NoiseLayer weights (torch.zeros); conv bias zeros
    nw1 = jnp.zeros((nf,), jnp.float32)
    nw2 = jnp.zeros((nf,), jnp.float32)
    bconv = jnp.zeros((nf,), jnp.float32)
    vecs = jnp.stack([cbias, nw1, nw2, bconv], axis=0)                 # (4, nf)

    # StyleMod linears: MyLinear(D, 2*nf, gain=1.0, use_wscale=True)
    #   init_std = 1, w_mul = D**-0.5, bias = 0
    he_std_style = D ** (-0.5)
    w1 = jax.random.normal(k_s1, (2 * nf, D), jnp.float32) * he_std_style  # effective
    w2 = jax.random.normal(k_s2, (2 * nf, D), jnp.float32) * he_std_style
    # block-diagonal merged weight: [dlat0 | dlat1] @ W -> [scale1|shift1|scale2|shift2]
    style_w = jnp.zeros((2 * D, 4 * nf), jnp.float32)
    style_w = style_w.at[:D, :2 * nf].set(w1.T)
    style_w = style_w.at[D:, 2 * nf:].set(w2.T)
    style_b = jnp.zeros((1, 4 * nf), jnp.float32)

    # MyConv2d(nf, nf, 3, gain=sqrt(2), use_wscale=True): w_mul = gain*(nf*9)**-0.5
    he_std_conv = gain * (nf * 9) ** (-0.5)
    wc = jax.random.normal(k_conv, (nf, nf, 3, 3), jnp.float32) * he_std_conv
    # (Cout, Cin, kh, kw) -> (kh, kw, Cin, Cout) -> (9*Cin, Cout), tap t = kh*3 + kw
    conv_w = jnp.transpose(wc, (2, 3, 1, 0)).reshape(9 * nf, nf)

    return {"const_sc": const_sc, "vecs": vecs,
            "style_w": style_w.astype(jnp.bfloat16),
            "style_b": style_b,
            "conv_w": conv_w.astype(jnp.bfloat16)}


# ---------------------------------------------------------------------------
# InputBlock forward
# ---------------------------------------------------------------------------
def input_block_forward(params, dlatents, noise_key):
    """dlatents: (B, 2, D) float32. Returns NCHW (B, nf, 4, 4)."""
    B, two, D = dlatents.shape
    assert two == 2
    S_, nf = params["const_sc"].shape
    assert S_ == S

    # Fresh per-call noise (per pixel, constant over channels). Kept (..., 1) so the
    # lane broadcast happens inside the kernel (no nf-wide HBM materialization).
    # TODO(synk): JAX PRNG stream differs from torch.randn; values are not bit-identical.
    noise = jax.random.normal(noise_key, (2, B, S, 1), jnp.float32)
    dlat3 = dlatents.reshape(B, 1, 2 * D).astype(jnp.float32)          # (B, 1, 2*D)

    out_bsc = pl.pallas_call(
        _input_block_kernel,
        out_shape=jax.ShapeDtypeStruct((B, S, nf), jnp.float32),
        grid=(B,),
        in_specs=[
            pl.BlockSpec((S, nf), lambda b: (0, 0)),              # const
            pl.BlockSpec((4, nf), lambda b: (0, 0)),              # packed per-channel vecs
            pl.BlockSpec((2, 1, S, 1), lambda b: (0, b, 0, 0)),   # noise (this sample)
            pl.BlockSpec((1, 1, 2 * D), lambda b: (b, 0, 0)),     # dlatents (this sample)
            pl.BlockSpec((2 * D, 4 * nf), lambda b: (0, 0)),      # merged style weight
            pl.BlockSpec((1, 4 * nf), lambda b: (0, 0)),          # merged style bias
            pl.BlockSpec((9 * nf, nf), lambda b: (0, 0)),         # packed conv weight
        ],
        out_specs=pl.BlockSpec((1, S, nf), lambda b: (b, 0, 0)),
        compiler_params=pltpu.CompilerParams(
            dimension_semantics=("parallel",)),                   # both TCs on v7x
    )(params["const_sc"], params["vecs"], noise, dlat3,
      params["style_w"], params["style_b"], params["conv_w"])

    # single layout op back to PyTorch NCHW
    # TODO(synk): if the downstream synthesis block is channels-last, skip this transpose.
    return jnp.transpose(out_bsc.reshape(B, H, W, nf), (0, 3, 1, 2))


if __name__ == "__main__":
    B, nf, dlatent_size = 2, 128, 32   # nf=128 keeps the lane dimension dense
    key = jax.random.PRNGKey(0)
    pkey, dkey, nkey = jax.random.split(key, 3)
    params = init_params(pkey, nf, dlatent_size)
    dlatents = jax.random.normal(dkey, (B, 2, dlatent_size), jnp.float32)

    fwd = jax.jit(input_block_forward)
    out = fwd(params, dlatents, nkey)
    out = jax.block_until_ready(out)
    assert out.shape == (B, nf, 4, 4), out.shape
    assert bool(jnp.all(jnp.isfinite(out)))
    print("KERNEL_OK")
</pallas_src>

<mosaic_0001>
module attributes {stable_mosaic.version = 11 : i64} {
  func.func @_input_block_kernel(%arg0: i32, %arg1: memref<16x128xf32, #tpu.memory_space<vmem>>, %arg2: memref<4x128xf32, #tpu.memory_space<vmem>>, %arg3: memref<2x1x16x1xf32, #tpu.memory_space<vmem>>, %arg4: memref<1x1x64xf32, #tpu.memory_space<vmem>>, %arg5: memref<64x512xbf16, #tpu.memory_space<vmem>>, %arg6: memref<1x512xf32, #tpu.memory_space<vmem>>, %arg7: memref<1152x128xbf16, #tpu.memory_space<vmem>>, %arg8: memref<1x16x128xf32, #tpu.memory_space<vmem>>) attributes {dimension_semantics = [#tpu.dimension_semantics<parallel>], iteration_bounds = array<i64: 2>, scalar_prefetch = 0 : i64, scratch_operands = 0 : i64, tpu.core_type = #tpu.core_type<tc>, window_params = [{pipeline_mode = #tpu.pipeline_mode<synchronous>, transform_indices = @transform_0, window_bounds = array<i64: 16, 128>}, {pipeline_mode = #tpu.pipeline_mode<synchronous>, transform_indices = @transform_1, window_bounds = array<i64: 4, 128>}, {transform_indices = @transform_2, window_bounds = array<i64: 2, 1, 16, 1>}, {transform_indices = @transform_3, window_bounds = array<i64: 1, 1, 64>}, {pipeline_mode = #tpu.pipeline_mode<synchronous>, transform_indices = @transform_4, window_bounds = array<i64: 64, 512>}, {pipeline_mode = #tpu.pipeline_mode<synchronous>, transform_indices = @transform_5, window_bounds = array<i64: 1, 512>}, {pipeline_mode = #tpu.pipeline_mode<synchronous>, transform_indices = @transform_6, window_bounds = array<i64: 1152, 128>}, {transform_indices = @transform_7, window_bounds = array<i64: 1, 16, 128>}]} {
    %c0 = arith.constant 0 : index
    %c0_0 = arith.constant 0 : index
    %c0_1 = arith.constant 0 : index
    %0 = vector.load %arg4[%c0, %c0_0, %c0_1] : memref<1x1x64xf32, #tpu.memory_space<vmem>>, vector<1x1x64xf32>
    %1 = vector.shape_cast %0 : vector<1x1x64xf32> to vector<1x64xf32>
    %2 = arith.truncf %1 : vector<1x64xf32> to vector<1x64xbf16>
    %c0_2 = arith.constant 0 : index
    %c0_3 = arith.constant 0 : index
    %3 = vector.load %arg5[%c0_2, %c0_3] : memref<64x512xbf16, #tpu.memory_space<vmem>>, vector<64x512xbf16>
    %cst = arith.constant dense<0.000000e+00> : vector<1x512xf32>
    %4 = tpu.matmul %2, %3, %cst {dimension_numbers = #tpu.dot_dimension_numbers<[1], [0], [0], [1], [0, 0, 1, 1], [], []>} : vector<1x64xbf16>, vector<64x512xbf16>, vector<1x512xf32> -> vector<1x512xf32>
    %c0_4 = arith.constant 0 : index
    %c0_5 = arith.constant 0 : index
    %5 = vector.load %arg6[%c0_4, %c0_5] : memref<1x512xf32, #tpu.memory_space<vmem>>, vector<1x512xf32>
    %6 = arith.addf %4, %5 : vector<1x512xf32>
    %7 = vector.extract_strided_slice %6 {offsets = [0, 0], sizes = [1, 128], strides = [1, 1]} : vector<1x512xf32> to vector<1x128xf32>
    %8 = vector.extract_strided_slice %6 {offsets = [0, 128], sizes = [1, 128], strides = [1, 1]} : vector<1x512xf32> to vector<1x128xf32>
    %9 = vector.extract_strided_slice %6 {offsets = [0, 256], sizes = [1, 128], strides = [1, 1]} : vector<1x512xf32> to vector<1x128xf32>
    %10 = vector.extract_strided_slice %6 {offsets = [0, 384], sizes = [1, 128], strides = [1, 1]} : vector<1x512xf32> to vector<1x128xf32>
    %c0_6 = arith.constant 0 : index
    %c0_7 = arith.constant 0 : index
    %11 = vector.load %arg2[%c0_6, %c0_7] : memref<4x128xf32, #tpu.memory_space<vmem>>, vector<4x128xf32>
    %12 = vector.extract_strided_slice %11 {offsets = [0, 0], sizes = [1, 128], strides = [1, 1]} : vector<4x128xf32> to vector<1x128xf32>
    %13 = vector.extract_strided_slice %11 {offsets = [1, 0], sizes = [1, 128], strides = [1, 1]} : vector<4x128xf32> to vector<1x128xf32>
    %14 = vector.extract_strided_slice %11 {offsets = [2, 0], sizes = [1, 128], strides = [1, 1]} : vector<4x128xf32> to vector<1x128xf32>
    %15 = vector.extract_strided_slice %11 {offsets = [3, 0], sizes = [1, 128], strides = [1, 1]} : vector<4x128xf32> to vector<1x128xf32>
    %c0_8 = arith.constant 0 : index
    %c0_9 = arith.constant 0 : index
    %c0_10 = arith.constant 0 : index
    %c0_11 = arith.constant 0 : index
    %16 = vector.load %arg3[%c0_8, %c0_9, %c0_10, %c0_11] : memref<2x1x16x1xf32, #tpu.memory_space<vmem>>, vector<2x1x16x1xf32>
    %17 = vector.extract_strided_slice %16 {offsets = [0, 0, 0, 0], sizes = [1, 1, 16, 1], strides = [1, 1, 1, 1]} : vector<2x1x16x1xf32> to vector<1x1x16x1xf32>
    %18 = vector.shape_cast %17 : vector<1x1x16x1xf32> to vector<16x1xf32>
    %19 = vector.extract_strided_slice %16 {offsets = [1, 0, 0, 0], sizes = [1, 1, 16, 1], strides = [1, 1, 1, 1]} : vector<2x1x16x1xf32> to vector<1x1x16x1xf32>
    %20 = vector.shape_cast %19 : vector<1x1x16x1xf32> to vector<16x1xf32>
    %c0_12 = arith.constant 0 : index
    %c0_13 = arith.constant 0 : index
    %21 = vector.load %arg1[%c0_12, %c0_13] : memref<16x128xf32, #tpu.memory_space<vmem>>, vector<16x128xf32>
    %22 = vector.broadcast %12 : vector<1x128xf32> to vector<16x128xf32>
    %23 = arith.addf %21, %22 : vector<16x128xf32>
    %24 = vector.broadcast %13 : vector<1x128xf32> to vector<16x128xf32>
    %25 = vector.broadcast %18 : vector<16x1xf32> to vector<16x128xf32>
    %26 = arith.mulf %24, %25 : vector<16x128xf32>
    %27 = arith.addf %23, %26 : vector<16x128xf32>
    %cst_14 = arith.constant 0.000000e+00 : f32
    %28 = vector.broadcast %cst_14 : f32 to vector<16x128xf32>
    %29 = arith.cmpf oge, %27, %28 : vector<16x128xf32>
    %cst_15 = arith.constant 2.000000e-01 : f32
    %30 = vector.broadcast %cst_15 : f32 to vector<16x128xf32>
    %31 = arith.mulf %30, %27 : vector<16x128xf32>
    %32 = arith.select %29, %27, %31 : vector<16x128xi1>, vector<16x128xf32>
    %cst_16 = arith.constant dense<0.000000e+00> : vector<128xf32>
    %33 = vector.multi_reduction <add>, %32, %cst_16 [0] : vector<16x128xf32> to vector<128xf32>
    %34 = vector.shape_cast %33 : vector<128xf32> to vector<1x128xf32>
    %cst_17 = arith.constant 6.250000e-02 : f32
    %35 = vector.broadcast %cst_17 : f32 to vector<1x128xf32>
    %36 = arith.mulf %34, %35 : vector<1x128xf32>
    %37 = arith.mulf %32, %32 : vector<16x128xf32>
    %cst_18 = arith.constant dense<0.000000e+00> : vector<128xf32>
    %38 = vector.multi_reduction <add>, %37, %cst_18 [0] : vector<16x128xf32> to vector<128xf32>
    %39 = vector.shape_cast %38 : vector<128xf32> to vector<1x128xf32>
    %cst_19 = arith.constant 6.250000e-02 : f32
    %40 = vector.broadcast %cst_19 : f32 to vector<1x128xf32>
    %41 = arith.mulf %39, %40 : vector<1x128xf32>
    %42 = arith.mulf %36, %36 : vector<1x128xf32>
    %43 = arith.subf %41, %42 : vector<1x128xf32>
    %44 = vector.broadcast %36 : vector<1x128xf32> to vector<16x128xf32>
    %45 = arith.subf %32, %44 : vector<16x128xf32>
    %cst_20 = arith.constant 9.99999974E-6 : f32
    %46 = vector.broadcast %cst_20 : f32 to vector<1x128xf32>
    %47 = arith.addf %43, %46 : vector<1x128xf32>
    %48 = math.rsqrt %47 : vector<1x128xf32>
    %49 = vector.broadcast %48 : vector<1x128xf32> to vector<16x128xf32>
    %50 = arith.mulf %45, %49 : vector<16x128xf32>
    %cst_21 = arith.constant 1.000000e+00 : f32
    %51 = vector.broadcast %cst_21 : f32 to vector<1x128xf32>
    %52 = arith.addf %7, %51 : vector<1x128xf32>
    %53 = vector.broadcast %52 : vector<1x128xf32> to vector<16x128xf32>
    %54 = arith.mulf %50, %53 : vector<16x128xf32>
    %55 = vector.broadcast %8 : vector<1x128xf32> to vector<16x128xf32>
    %56 = arith.addf %54, %55 : vector<16x128xf32>
    %57 = tpu.iota {dimensions = array<i32: 0>} : vector<16x1xi32>
    %c2_i32 = arith.constant 2 : i32
    %58 = vector.broadcast %c2_i32 : i32 to vector<16x1xi32>
    %59 = arith.shrsi %57, %58 : vector<16x1xi32>
    %c3_i32 = arith.constant 3 : i32
    %60 = vector.broadcast %c3_i32 : i32 to vector<16x1xi32>
    %61 = arith.andi %57, %60 : vector<16x1xi32>
    %c1_i32 = arith.constant 1 : i32
    %62 = vector.broadcast %c1_i32 : i32 to vector<16x1xi32>
    %63 = arith.cmpi sge, %59, %62 : vector<16x1xi32>
    %c2_i32_22 = arith.constant 2 : i32
    %64 = vector.broadcast %c2_i32_22 : i32 to vector<16x1xi32>
    %65 = arith.cmpi sle, %59, %64 : vector<16x1xi32>
    %c1_i32_23 = arith.constant 1 : i32
    %66 = vector.broadcast %c1_i32_23 : i32 to vector<16x1xi32>
    %67 = arith.cmpi sge, %61, %66 : vector<16x1xi32>
    %c2_i32_24 = arith.constant 2 : i32
    %68 = vector.broadcast %c2_i32_24 : i32 to vector<16x1xi32>
    %69 = arith.cmpi sle, %61, %68 : vector<16x1xi32>
    %c5_i32 = arith.constant 5 : i32
    %70 = tpu.dynamic_rotate %56 by %c5_i32 dim 0 : vector<16x128xf32>, i32 -> vector<16x128xf32>
    %71 = arith.andi %63, %67 : vector<16x1xi1>
    %cst_25 = arith.constant 0.000000e+00 : f32
    %72 = vector.shape_cast %71 : vector<16x1xi1> to vector<16x1xi1>
    %73 = vector.broadcast %72 : vector<16x1xi1> to vector<16x128xi1>
    %74 = vector.broadcast %cst_25 : f32 to vector<16x128xf32>
    %75 = arith.select %73, %70, %74 : vector<16x128xi1>, vector<16x128xf32>
    %c4_i32 = arith.constant 4 : i32
    %76 = tpu.dynamic_rotate %56 by %c4_i32 dim 0 : vector<16x128xf32>, i32 -> vector<16x128xf32>
    %cst_26 = arith.constant 0.000000e+00 : f32
    %77 = vector.shape_cast %63 : vector<16x1xi1> to vector<16x1xi1>
    %78 = vector.broadcast %77 : vector<16x1xi1> to vector<16x128xi1>
    %79 = vector.broadcast %cst_26 : f32 to vector<16x128xf32>
    %80 = arith.select %78, %76, %79 : vector<16x128xi1>, vector<16x128xf32>
    %c3_i32_27 = arith.constant 3 : i32
    %81 = tpu.dynamic_rotate %56 by %c3_i32_27 dim 0 : vector<16x128xf32>, i32 -> vector<16x128xf32>
    %82 = arith.andi %63, %69 : vector<16x1xi1>
    %cst_28 = arith.constant 0.000000e+00 : f32
    %83 = vector.shape_cast %82 : vector<16x1xi1> to vector<16x1xi1>
    %84 = vector.broadcast %83 : vector<16x1xi1> to vector<16x128xi1>
    %85 = vector.broadcast %cst_28 : f32 to vector<16x128xf32>
    %86 = arith.select %84, %81, %85 : vector<16x128xi1>, vector<16x128xf32>
    %c1_i32_29 = arith.constant 1 : i32
    %87 = tpu.dynamic_rotate %56 by %c1_i32_29 dim 0 : vector<16x128xf32>, i32 -> vector<16x128xf32>
    %cst_30 = arith.constant 0.000000e+00 : f32
    %88 = vector.shape_cast %67 : vector<16x1xi1> to vector<16x1xi1>
    %89 = vector.broadcast %88 : vector<16x1xi1> to vector<16x128xi1>
    %90 = vector.broadcast %cst_30 : f32 to vector<16x128xf32>
    %91 = arith.select %89, %87, %90 : vector<16x128xi1>, vector<16x128xf32>
    %c15_i32 = arith.constant 15 : i32
    %92 = tpu.dynamic_rotate %56 by %c15_i32 dim 0 : vector<16x128xf32>, i32 -> vector<16x128xf32>
    %cst_31 = arith.constant 0.000000e+00 : f32
    %93 = vector.shape_cast %69 : vector<16x1xi1> to vector<16x1xi1>
    %94 = vector.broadcast %93 : vector<16x1xi1> to vector<16x128xi1>
    %95 = vector.broadcast %cst_31 : f32 to vector<16x128xf32>
    %96 = arith.select %94, %92, %95 : vector<16x128xi1>, vector<16x128xf32>
    %c13_i32 = arith.constant 13 : i32
    %97 = tpu.dynamic_rotate %56 by %c13_i32 dim 0 : vector<16x128xf32>, i32 -> vector<16x128xf32>
    %98 = arith.andi %65, %67 : vector<16x1xi1>
    %cst_32 = arith.constant 0.000000e+00 : f32
    %99 = vector.shape_cast %98 : vector<16x1xi1> to vector<16x1xi1>
    %100 = vector.broadcast %99 : vector<16x1xi1> to vector<16x128xi1>
    %101 = vector.broadcast %cst_32 : f32 to vector<16x128xf32>
    %102 = arith.select %100, %97, %101 : vector<16x128xi1>, vector<16x128xf32>
    %c12_i32 = arith.constant 12 : i32
    %103 = tpu.dynamic_rotate %56 by %c12_i32 dim 0 : vector<16x128xf32>, i32 -> vector<16x128xf32>
    %cst_33 = arith.constant 0.000000e+00 : f32
    %104 = vector.shape_cast %65 : vector<16x1xi1> to vector<16x1xi1>
    %105 = vector.broadcast %104 : vector<16x1xi1> to vector<16x128xi1>
    %106 = vector.broadcast %cst_33 : f32 to vector<16x128xf32>
    %107 = arith.select %105, %103, %106 : vector<16x128xi1>, vector<16x128xf32>
    %c11_i32 = arith.constant 11 : i32
    %108 = tpu.dynamic_rotate %56 by %c11_i32 dim 0 : vector<16x128xf32>, i32 -> vector<16x128xf32>
    %109 = arith.andi %65, %69 : vector<16x1xi1>
    %cst_34 = arith.constant 0.000000e+00 : f32
    %110 = vector.shape_cast %109 : vector<16x1xi1> to vector<16x1xi1>
    %111 = vector.broadcast %110 : vector<16x1xi1> to vector<16x128xi1>
    %112 = vector.broadcast %cst_34 : f32 to vector<16x128xf32>
    %113 = arith.select %111, %108, %112 : vector<16x128xi1>, vector<16x128xf32>
    %114 = tpu.concatenate %75, %80, %86, %91, %56, %96, %102, %107, %113 in 1 : vector<16x128xf32>, vector<16x128xf32>, vector<16x128xf32>, vector<16x128xf32>, vector<16x128xf32>, vector<16x128xf32>, vector<16x128xf32>, vector<16x128xf32>, vector<16x128xf32> -> vector<16x1152xf32>
    %115 = arith.truncf %114 : vector<16x1152xf32> to vector<16x1152xbf16>
    %c0_35 = arith.constant 0 : index
    %c0_36 = arith.constant 0 : index
    %116 = vector.load %arg7[%c0_35, %c0_36] : memref<1152x128xbf16, #tpu.memory_space<vmem>>, vector<1152x128xbf16>
    %cst_37 = arith.constant dense<0.000000e+00> : vector<16x128xf32>
    %117 = tpu.matmul %115, %116, %cst_37 {dimension_numbers = #tpu.dot_dimension_numbers<[1], [0], [0], [1], [0, 0, 1, 1], [], []>} : vector<16x1152xbf16>, vector<1152x128xbf16>, vector<16x128xf32> -> vector<16x128xf32>
    %118 = vector.broadcast %15 : vector<1x128xf32> to vector<16x128xf32>
    %119 = arith.addf %117, %118 : vector<16x128xf32>
    %120 = vector.broadcast %14 : vector<1x128xf32> to vector<16x128xf32>
    %121 = vector.broadcast %20 : vector<16x1xf32> to vector<16x128xf32>
    %122 = arith.mulf %120, %121 : vector<16x128xf32>
    %123 = arith.addf %119, %122 : vector<16x128xf32>
    %cst_38 = arith.constant 0.000000e+00 : f32
    %124 = vector.broadcast %cst_38 : f32 to vector<16x128xf32>
    %125 = arith.cmpf oge, %123, %124 : vector<16x128xf32>
    %cst_39 = arith.constant 2.000000e-01 : f32
    %126 = vector.broadcast %cst_39 : f32 to vector<16x128xf32>
    %127 = arith.mulf %126, %123 : vector<16x128xf32>
    %128 = arith.select %125, %123, %127 : vector<16x128xi1>, vector<16x128xf32>
    %cst_40 = arith.constant dense<0.000000e+00> : vector<128xf32>
    %129 = vector.multi_reduction <add>, %128, %cst_40 [0] : vector<16x128xf32> to vector<128xf32>
    %130 = vector.shape_cast %129 : vector<128xf32> to vector<1x128xf32>
    %cst_41 = arith.constant 6.250000e-02 : f32
    %131 = vector.broadcast %cst_41 : f32 to vector<1x128xf32>
    %132 = arith.mulf %130, %131 : vector<1x128xf32>
    %133 = arith.mulf %128, %128 : vector<16x128xf32>
    %cst_42 = arith.constant dense<0.000000e+00> : vector<128xf32>
    %134 = vector.multi_reduction <add>, %133, %cst_42 [0] : vector<16x128xf32> to vector<128xf32>
    %135 = vector.shape_cast %134 : vector<128xf32> to vector<1x128xf32>
    %cst_43 = arith.constant 6.250000e-02 : f32
    %136 = vector.broadcast %cst_43 : f32 to vector<1x128xf32>
    %137 = arith.mulf %135, %136 : vector<1x128xf32>
    %138 = arith.mulf %132, %132 : vector<1x128xf32>
    %139 = arith.subf %137, %138 : vector<1x128xf32>
    %140 = vector.broadcast %132 : vector<1x128xf32> to vector<16x128xf32>
    %141 = arith.subf %128, %140 : vector<16x128xf32>
    %cst_44 = arith.constant 9.99999974E-6 : f32
    %142 = vector.broadcast %cst_44 : f32 to vector<1x128xf32>
    %143 = arith.addf %139, %142 : vector<1x128xf32>
    %144 = math.rsqrt %143 : vector<1x128xf32>
    %145 = vector.broadcast %144 : vector<1x128xf32> to vector<16x128xf32>
    %146 = arith.mulf %141, %145 : vector<16x128xf32>
    %cst_45 = arith.constant 1.000000e+00 : f32
    %147 = vector.broadcast %cst_45 : f32 to vector<1x128xf32>
    %148 = arith.addf %9, %147 : vector<1x128xf32>
    %149 = vector.broadcast %148 : vector<1x128xf32> to vector<16x128xf32>
    %150 = arith.mulf %146, %149 : vector<16x128xf32>
    %151 = vector.broadcast %10 : vector<1x128xf32> to vector<16x128xf32>
    %152 = arith.addf %150, %151 : vector<16x128xf32>
    %c0_46 = arith.constant 0 : index
    %c0_47 = arith.constant 0 : index
    %c0_48 = arith.constant 0 : index
    %153 = vector.load %arg8[%c0_46, %c0_47, %c0_48] : memref<1x16x128xf32, #tpu.memory_space<vmem>>, vector<1x16x128xf32>
    %154 = vector.shape_cast %153 : vector<1x16x128xf32> to vector<16x128xf32>
    %155 = vector.shape_cast %152 : vector<16x128xf32> to vector<1x16x128xf32>
    tpu.vector_store %arg8[%c0_46, %c0_47, %c0_48], %155 {strides = array<i32>} : memref<1x16x128xf32, #tpu.memory_space<vmem>>, vector<1x16x128xf32>,
    return
  }
  func.func @transform_0(%arg0: i32) -> (i32, i32) {
    %c0_i32 = arith.constant 0 : i32
    %c0_i32_0 = arith.constant 0 : i32
    %c0_i32_1 = arith.constant 0 : i32
    return %c0_i32, %c0_i32_0 : i32, i32
  }
  func.func @transform_1(%arg0: i32) -> (i32, i32) {
    %c0_i32 = arith.constant 0 : i32
    %c0_i32_0 = arith.constant 0 : i32
    %c0_i32_1 = arith.constant 0 : i32
    return %c0_i32, %c0_i32_0 : i32, i32
  }
  func.func @transform_2(%arg0: i32) -> (i32, i32, i32, i32) {
    %c0_i32 = arith.constant 0 : i32
    %c0_i32_0 = arith.constant 0 : i32
    %c0_i32_1 = arith.constant 0 : i32
    %c0_i32_2 = arith.constant 0 : i32
    return %c0_i32, %arg0, %c0_i32_0, %c0_i32_1 : i32, i32, i32, i32
  }
  func.func @transform_3(%arg0: i32) -> (i32, i32, i32) {
    %c0_i32 = arith.constant 0 : i32
    %c0_i32_0 = arith.constant 0 : i32
    %c0_i32_1 = arith.constant 0 : i32
    return %arg0, %c0_i32, %c0_i32_0 : i32, i32, i32
  }
  func.func @transform_4(%arg0: i32) -> (i32, i32) {
    %c0_i32 = arith.constant 0 : i32
    %c0_i32_0 = arith.constant 0 : i32
    %c0_i32_1 = arith.constant 0 : i32
    return %c0_i32, %c0_i32_0 : i32, i32
  }
  func.func @transform_5(%arg0: i32) -> (i32, i32) {
    %c0_i32 = arith.constant 0 : i32
    %c0_i32_0 = arith.constant 0 : i32
    %c0_i32_1 = arith.constant 0 : i32
    return %c0_i32, %c0_i32_0 : i32, i32
  }
  func.func @transform_6(%arg0: i32) -> (i32, i32) {
    %c0_i32 = arith.constant 0 : i32
    %c0_i32_0 = arith.constant 0 : i32
    %c0_i32_1 = arith.constant 0 : i32
    return %c0_i32, %c0_i32_0 : i32, i32
  }
  func.func @transform_7(%arg0: i32) -> (i32, i32, i32) {
    %c0_i32 = arith.constant 0 : i32
    %c0_i32_0 = arith.constant 0 : i32
    %c0_i32_1 = arith.constant 0 : i32
    return %arg0, %c0_i32, %c0_i32_0 : i32, i32, i32
  }
}

</mosaic_0001>

<bundles_post_ra>
// kernel: input_block_forward.1
= control target key start
LH: loop header
LB: loop body
LE: loop exit
PB: predicated region body
PF: predicated region fallthrough
CT: control target
= control target key end

     0   :  { %12 = vsyncpa [#allocation4], 0  ;;  %s2710_s0 = inlined_call_operand.vmem [shape: f32[16,128], index: 0, kind: input, shape index: {}]   ;;  %s2711_s1 = inlined_call_operand.vmem [shape: f32[4,128], index: 1, kind: input, shape index: {}]   ;;  %s2712_s2 = inlined_call_operand.vmem [shape: f32[2,2,16,1], index: 2, kind: input, shape index: {}]   ;;  %s2713_s3 = inlined_call_operand.vmem [shape: f32[2,1,64], index: 3, kind: input, shape index: {}]   ;;  %s2714_s4 = inlined_call_operand.hbm [shape: bf16[64,512], index: 4, kind: input, shape index: {}]   ;;  %s2715_s5 = inlined_call_operand.vmem [shape: f32[1,512], index: 5, kind: input, shape index: {}]   ;;  %s2716_s6 = inlined_call_operand.hbm [shape: bf16[1152,128], index: 6, kind: input, shape index: {}]   ;;  %s2717_s7 = inlined_call_operand.hbm [shape: f32[2,16,128], index: 7, kind: output, shape index: {}]  }
   0x1   :  { %13 = vsyncpa [#allocation7], 0 }
   0x2   :  { %14 = vsyncpa [#allocation5], 0 }
   0x3   :  { %16 = vsyncpa [#allocation5 + $0x1], 0  ;;  %s2316_s24 = smov 0   ;;  %s2318_s25 = smov 0  }
   0x4   :  { %s2320_s26 = smov 0   ;;  %s2322_s27 = smov 0  }
   0x5 LB: > { %s2337_s28 = sadd.s32 4294967295, %s2262_s27   ;;  %s1720_s29 = sadd.s32 4294967294, %s2262_s27   ;;  %s2262_s27 = sphi %s2322_s27, %s2757_s27   ;;  %s2258_s26 = sphi %s2320_s26, %s2756_s26   ;;  %s2254_s25 = sphi %s2318_s25, %s2755_s25   ;;  %s2250_s24 = sphi %s2316_s24, %s2754_s24  }
   0x6   : > { %s2341_s30 = sadd.s32 1, %s2262_s27   ;;  %s71_s8 = sadd.s32 1, %s2258_s26 }
   0x7   : > { %s68_s9 = ssub.s32 %s2262_s27, %s2341_s30  ;;  %p78_p0 = scmp.ne.s32.totalorder %s2258_s26, %s2254_s25 }
   0x8   : > { %p69_p1 = scmp.eq.s32.totalorder %s68_s9, 0  ;;  %p79_p2 = scmp.eq.s32.totalorder %s2262_s27, 0 }
   0x9   : > { %p197_p3 = scmp.eq.s32.totalorder %s2337_s28, 1  ;;  %p202_p4 = scmp.ne.s32.totalorder %s2254_s25, %s2250_s24 }
   0xa   : > { %s2353_s10 = scalar_select %p69_p1, %s2258_s26, %s71_s8  }
   0xb   : > { %p2355_p5 = por %p79_p2, %p78_p0  ;;  %p2359_p6 = por %p197_p3, %p78_p0 }
   0xc   : > { %p203_p7 = scmp.eq.s32.totalorder %s1720_s29, 1  ;;  %p1721_p8 = scmp.ge.s32.totalorder %s2262_s27, 1 }
   0xd   : > { %s2721_s12 = scalar_select %p2359_p6, 1, 0 }
   0xe   : > { %p210_p9 = scmp.lt.s32.totalorder %s2262_s27, 3  ;;  %p2365_p10 = por %p203_p7, %p202_p4 }
   0xf   : > { %p2718_p11 = scmp.eq.s32.totalorder %s2337_s28, 0  ;;  %s2264_s15 = smov [#allocation3]  }
  0x10   : > { %s2722_s13 = scalar_select %p2365_p10, 1, 0 }
  0x11   : > { %p2370_p12 = pnand %p1721_p8, %p210_p9  ;;  %s228_s16 = sshll.u32 %s2264_s15, 4  ;;  %s229_s16 = int_to_ptr.vmem [resolvable:$true] %s228_s16 }
  0x12   : > { %s2265_s18 = smov [#allocation6]   ;;  %s2153_s20 = scalar_lea.vmem %s229_s16, 2048 }
  0x13   : > { %p1981_p13 = pneg %p2370_p12  ;;  %s244_s19 = sshll.u32 %s2265_s18, 4  ;;  %s245_s19 = int_to_ptr.vmem [resolvable:$true] %s244_s19 }
  0x14   : > { %p2154_p2 = scmp.ne.s32.totalorder %s229_s16, %s2153_s20  ;;  %p2161_p7 = scmp.lt.s32.totalorder %s229_s16, %s229_s16 }
  0x15   : > { %p2378_p0 = pnand %p2718_p11, %p1981_p13  ;;  %p2162_p8 = scmp.lt.s32.totalorder %s2153_s20, %s2153_s20 }
  0x17   : > { %p2144_p1 = pneg %p2378_p0  ;;  %p2163_p9 = por %p2162_p8, %p2161_p7 }
  0x19   : > { %p2156_p3 = pnand %p2154_p2, %p2144_p1 }
  0x1b   : > { %p2157_p4 = pneg %p2156_p3 }
  0x1d   : > { %p2164_p13 = pnand %p2163_p9, %p2157_p4 }
  0x1f   : > { %2167 = shalt.err (!%p2164_p13)
}
  0x20   : > { %s2266_s21 = smov 256   ;;  %s2267_s22 = smov 16  }
  0x21   : > { %1984 = dma.hbm_to_vmem [thread:$0]  (!%p2378_p0), %s2714_s4, 2048, %s229_s16, [#allocation4], %s2266_s21, %s2266_s21, %s2267_s22  }
  0x22   : > { %s2179_s8 = scalar_lea.vmem %s245_s19, 9216  ;;  %p2187_p10 = scmp.lt.s32.totalorder %s245_s19, %s245_s19 }
  0x23   : > { %p2180_p11 = scmp.ne.s32.totalorder %s245_s19, %s2179_s8  ;;  %p2188_p6 = scmp.lt.s32.totalorder %s2179_s8, %s2179_s8 }
  0x25   : > { %p2182_p2 = pnand %p2180_p11, %p2144_p1  ;;  %p2189_p7 = por %p2188_p6, %p2187_p10 }
  0x27   : > { %p2183_p3 = pneg %p2182_p2 }
  0x29   : > { %p2190_p4 = pnand %p2189_p7, %p2183_p3 }
  0x2b   : > { %2193 = shalt.err (!%p2190_p4)
}
  0x2c   : > { %s2268_s9 = smov 64   ;;  %s2269_s15 = smov 4  }
  0x2d   : > { %1987 = dma.hbm_to_vmem [thread:$0]  (!%p2378_p0), %s2716_s6, 9216, %s245_s19, [#allocation7], %s2268_s9, %s2268_s9, %s2269_s15  }
  0x2e   : > { %p1724_p8 = scmp.ge.s32.totalorder %s2262_s27, 2 }
  0x30   : > { %254 = sbr.rel (%p1724_p8) target bundleno = 59 (0x3b), region = 36 }
  0x35   : > { %257 = sbr.rel (!%p2355_p5) target bundleno = 59 (0x3b), region = 40  ;;  %s259_s16 = sand.u32 (%p2355_p5), 1, %s2258_s26  }
  0x36   : > { %s1852_s21 = sshll.u32 (%p2355_p5), %s2262_s27, 4  ;;  %s1725_s22 = sshll.u32 (%p2355_p5), %s259_s16, 5 }
  0x37   : > { %s264_s17 = scalar_lea.vmem (%p2355_p5), %s2712_s2, %s1852_s21  ;;  %s261_s19 = scalar_lea.vmem (%p2355_p5), [#allocation2], %s1725_s22 }
  0x38   : > { %v299_v0 = vld [vmem:[%s264_s17] sm:$0xff] (%p2355_p5)  ;;  %v301_v1 = vld [vmem:[%s264_s17 + $0x8] sm:$0xff] (%p2355_p5) }
  0x39   : > { %v303_v2 = vld [vmem:[%s264_s17 + $0x20] sm:$0xff] (%p2355_p5)  ;;  %300 = vst [vmem:[%s261_s19] sm:$0xff] (%p2355_p5), %v299_v0  ;;  %302 = vst [vmem:[%s261_s19 + $0x8] sm:$0xff] (%p2355_p5), %v301_v1  ;;  %v305_v3 = vld [vmem:[%s264_s17 + $0x28] sm:$0xff] (%p2355_p5) }
  0x3a   : > { %304 = vst [vmem:[%s261_s19 + $0x10] sm:$0xff] %v303_v2  ;;  %306 = vst [vmem:[%s261_s19 + $0x18] sm:$0xff] %v305_v3 }
  0x3b PF: > { %321 = sbr.rel (%p2370_p12) target bundleno = 621 (0x26d), region = 82  ;;  %s2413_s11 = sand.u32 (!%p2370_p12), 1, %s2254_s25  }
  0x3c   : > { %s1729_s8 = sshll.u32 (!%p2370_p12), %s2413_s11, 5  ;;  %p2725_p5 = scmp.eq.s32.totalorder (!%p2370_p12), %s2337_s28, 0 }
  0x3d   : > { %s2416_s9 = scalar_lea.vmem (!%p2370_p12), [#allocation2], %s1729_s8 }
  0x40   : > { %2237 = dma.done.wait (%p2725_p5), [#allocation4], 2048   ;;  %p2726_p6 = pmov %p2725_p5 }
  0x41   : > { %p2727_p10 = pmov %p2725_p5 }
  0x42   : > { %2239 = vsyncadd (%p2726_p6), [#allocation4], 4294965248 }
  0x43   : > { %2241 = dma.done.wait (%p2727_p10), [#allocation7], 9216   ;;  %p2728_p11 = pmov %p2725_p5 }
  0x44   : > { %v2270_v4 = vmov 0   ;;  %p366_p12 = scmp.lt.s32.totalorder %s2337_s28, 1  ;;  %v2042_v5 = vld [vmem:[#allocation3 + $0x64] ss:$16 sps:$4 sm:$0xff]   ;;  %v2044_v6 = vld [vmem:[#allocation3 + $0x60] ss:$16 sps:$4 sm:$0xff]   ;;  %v470_v59 = vlaneseq }
  0x45   : > { %2243 = vsyncadd (%p2728_p11), [#allocation7], 4294958080  ;;  %2040 = vset.pattern.permute.xlu0 %v2270_v4  ;;  %526 = vmatprep.mubr.bf16.mxu1 %v2270_v4  ;;  %v577_v7 = vld [vmem:[%s2416_s9] sm:$0xff]  ;;  %v578_v10 = vld [vmem:[%s2416_s9 + $0x8] sm:$0xff]  ;;  %vm490_vm0 = vcmask 523264   ;;  %p2752_p1 = scmp.ne.s32.totalorder %s2721_s12, 0 }
  0x46   : > { %2041 = vset.pattern.permute.xlu1 %v2270_v4  ;;  %502 = vmatprep.subr.bf16.mxu1 %v2042_v5  ;;  %v2045_v8 = vld [vmem:[#allocation3 + $0x44] ss:$16 sps:$4 sm:$0xff]   ;;  %v2047_v9 = vld [vmem:[#allocation3 + $0x40] ss:$16 sps:$4 sm:$0xff]   ;;  %s367_s14 = scalar_select %p366_p12, %s2337_s28, 1  ;;  %v2066_v20 = vld [vmem:[#allocation6 + $0x78] sm:$0xff]  }
  0x47   : > { %595 = vperm.xlu0 %2040, %v577_v7   ;;  %503 = vmatpush1.bf16.msra.mxu1 %v2044_v6  ;;  %v2048_v11 = vld [vmem:[#allocation3 + $0x24] ss:$16 sps:$4 sm:$0xff]   ;;  %v2050_v12 = vld [vmem:[#allocation3 + $0x20] ss:$16 sps:$4 sm:$0xff]   ;;  %v2054_v17 = vld [vmem:[#allocation3 + $0x68] ss:$16 sps:$4 sm:$0xff]  }
  0x48   : > { %504 = vmatprep.subr.bf16.mxu1 %v2045_v8  ;;  %s368_s20 = scalar_lea.vmem %s2713_s3, %s367_s14  ;;  %v2051_v13 = vld [vmem:[#allocation3 + $0x4] ss:$16 sps:$4 sm:$0xff]   ;;  %v2053_v14 = vld [vmem:[#allocation3] ss:$16 sps:$4 sm:$0xff]   ;;  %v2056_v18 = vld [vmem:[#allocation3 + $0x6c] ss:$16 sps:$4 sm:$0xff]   ;;  %1854 = vmatprep.subr.bf16.mxu0 %v2066_v20 }
  0x49   : > { %v370_v15 = vld [vmem:[%s368_s20] sm:$0x1]  ;;  %v2059_v19 = vld [vmem:[#allocation3 + $0x4c] ss:$16 sps:$4 sm:$0xff]   ;;  %v2057_v21 = vld [vmem:[#allocation3 + $0x48] ss:$16 sps:$4 sm:$0xff]  }
  0x4a   : > { %v371_v16 = vpack.c.bf16 %v370_v15, %v370_v15  ;;  %v2068_v22 = vld [vmem:[#allocation6 + $0x38] sm:$0xff]   ;;  %v2070_v24 = vld [vmem:[#allocation6 + $0x70] sm:$0xff]   ;;  %v2074_v26 = vld [vmem:[#allocation6 + $0x68] sm:$0xff]   ;;  %v2435_v60 = vshrl.u32 %v470_v59, 7  ;;  %s1853_s14 = sshll.u32 %s2337_s28, 8  ;;  %s1608_s28 = scalar_lea.sflag [#allocation5], %s2413_s11 }
  0x4b   : > { %600 = vperm.xlu0 %2040, %v578_v10   ;;  %505 = vmatpush1.bf16.msra.mxu1 %v2047_v9  ;;  %v2062_v23 = vld [vmem:[#allocation3 + $0x2c] ss:$16 sps:$4 sm:$0xff]   ;;  %v2072_v25 = vld [vmem:[#allocation6 + $0x30] sm:$0xff]   ;;  %v2060_v27 = vld [vmem:[#allocation3 + $0x28] ss:$16 sps:$4 sm:$0xff]   ;;  %s2665_s21 = scalar_lea.hbm %s2717_s7, %s1853_s14  ;;  %s2273_s23 = smov [#allocation8]  }
  0x4c   : > { %506 = vmatprep.subr.bf16.mxu1 %v2048_v11  ;;  %1855 = vmatpush3.bf16.msra.mxu0 %v2068_v22  ;;  %v2065_v28 = vld [vmem:[#allocation3 + $0xc] ss:$16 sps:$4 sm:$0xff]   ;;  %v2078_v30 = vld [vmem:[#allocation6 + $0x60] sm:$0xff]   ;;  %v2063_v31 = vld [vmem:[#allocation3 + $0x8] ss:$16 sps:$4 sm:$0xff]   ;;  %v2438_v62 = vsub.s32 0, %v2435_v60 }
  0x4d   : > { %1856 = vmatprep.subr.bf16.mxu0 %v2070_v24  ;;  %v2076_v29 = vld [vmem:[#allocation6 + $0x28] sm:$0xff]   ;;  %v2067_v32 = vld [vmem:[#allocation6 + $0xf8] sm:$0xff]   ;;  %v2080_v33 = vld [vmem:[#allocation6 + $0x20] sm:$0xff]   ;;  %v476_v63 = vsub.s32 1, %v2435_v60  ;;  %v657_v20 = vand.u32 3, %v2435_v60  ;;  %v655_v22 = vshra.s32 %v2435_v60, 2 }
  0x4e   : > { %v2069_v34 = vld [vmem:[#allocation6 + $0xb8] sm:$0xff]   ;;  %v2071_v35 = vld [vmem:[#allocation6 + $0xf0] sm:$0xff]   ;;  %v2075_v37 = vld [vmem:[#allocation6 + $0xe8] sm:$0xff]   ;;  %s2198_s29 = sshll.u32 %s2273_s23, 4  ;;  %s2199_s29 = int_to_ptr.vmem [resolvable:$false] %s2198_s29 }
  0x4f   : > { %507 = vmatpush1.bf16.msra.mxu1 %v2050_v12  ;;  %v2073_v36 = vld [vmem:[#allocation6 + $0xb0] sm:$0xff]   ;;  %v2077_v38 = vld [vmem:[#allocation6 + $0xa8] sm:$0xff]   ;;  %v2079_v39 = vld [vmem:[#allocation6 + $0xe0] sm:$0xff]   ;;  %vm2458_vm3 = vcmp.le.s32.totalorder %v657_v20, 2  ;;  %vm2462_vm4 = vcmp.le.s32.totalorder %v655_v22, 2  ;;  %vm2497_vm10 = vcmp.ge.s32.totalorder %v655_v22, 1 }
  0x50   : > { %508 = vmatprep.subr.bf16.mxu1 %v2051_v13  ;;  %1857 = vmatpush3.bf16.msra.mxu0 %v2072_v25  ;;  %v2081_v40 = vld [vmem:[#allocation6 + $0xa0] sm:$0xff]   ;;  %v2082_v41 = vld [vmem:[#allocation6 + $0x58] sm:$0xff]   ;;  %v2086_v45 = vld [vmem:[#allocation6 + $0x50] sm:$0xff]   ;;  %vm2506_vm12 = vcmp.ge.s32.totalorder %v657_v20, 1  ;;  %s2200_s17 = scalar_lea.vmem %s2199_s29, 512 }
  0x51   : > { %1858 = vmatprep.subr.bf16.mxu0 %v2074_v26  ;;  %v2083_v42 = vld [vmem:[#allocation6 + $0xd8] sm:$0xff]   ;;  %v2087_v46 = vld [vmem:[#allocation6 + $0xd0] sm:$0xff]   ;;  %v2090_v49 = vld [vmem:[#allocation6 + $0x48] sm:$0xff]  }
  0x52   : > { %v2084_v43 = vld [vmem:[#allocation6 + $0x18] sm:$0xff]   ;;  %v2088_v47 = vld [vmem:[#allocation6 + $0x10] sm:$0xff]   ;;  %v2091_v50 = vld [vmem:[#allocation6 + $0xc8] sm:$0xff]  }
  0x53   : > { %509 = vmatpush1.bf16.msra.mxu1 %v2053_v14  ;;  %v2085_v44 = vld [vmem:[#allocation6 + $0x98] sm:$0xff]   ;;  %v2089_v48 = vld [vmem:[#allocation6 + $0x90] sm:$0xff]   ;;  %v2092_v51 = vld [vmem:[#allocation6 + $0x8] sm:$0xff]  }
  0x54   : > { %543 = vmatprep.subr.bf16.mxu1 %v2056_v18  ;;  %1859 = vmatpush3.bf16.msra.mxu0 %v2076_v29  ;;  %v2093_v52 = vld [vmem:[#allocation6 + $0x88] sm:$0xff]   ;;  %v2094_v53 = vld [vmem:[#allocation6 + $0x40] sm:$0xff]   ;;  %v2098_v57 = vld [vmem:[#allocation6 + $0x178] sm:$0xff]  }
  0x55   : > { %1860 = vmatprep.subr.bf16.mxu0 %v2078_v30  ;;  %v2095_v54 = vld [vmem:[#allocation6 + $0xc0] sm:$0xff]   ;;  %v2099_v58 = vld [vmem:[#allocation6 + $0x1f8] sm:$0xff]   ;;  %vm740_vm7 = vmand %vm2462_vm4, %vm2458_vm3 }
  0x56   : > { %1749 = vmatmul.mubr.msk.bf16.vlgmr.msra.gmra.mxu1 %vm490_vm0, %v371_v16  ;;  %v2096_v55 = vld [vmem:[#allocation6] sm:$0xff]   ;;  %v2132_v29 = vld [vmem:[#allocation6 + $0x228] sm:$0xff]  }
  0x57   : > { %567 = vmatprep.mubr.bf16.mxu1 %v2270_v4  ;;  %544 = vmatpush1.bf16.msra.mxu1 %v2054_v17  ;;  %v2097_v56 = vld [vmem:[#allocation6 + $0x80] sm:$0xff]   ;;  %v582_v4 = vld [vmem:[%s2710_s0 + $0x8] sm:$0xff] }
  0x58   : > { %545 = vmatprep.subr.bf16.mxu1 %v2059_v19  ;;  %1861 = vmatpush3.bf16.msra.mxu0 %v2080_v33  ;;  %v2444_v0 = vld [vmem:[%s2711_s1] sm:$0xf]  ;;  %v579_v33 = vld [vmem:[%s2416_s9 + $0x10] sm:$0xff] }
  0x59   : > { %1862 = vmatprep.subr.bf16.mxu0 %v2082_v41  ;;  %v586_v1 = vrot.slane %v2444_v0, %v2438_v62  ;;  %v592_v2 = vrot.slane %v2444_v0, %v476_v63  ;;  %v581_v3 = vld [vmem:[%s2710_s0] sm:$0xff]  ;;  %1548 = vperm.xlu1 %2041, %v579_v33  }
  0x5a   : > { %v2110_v26 = vld [vmem:[#allocation6 + $0x160] sm:$0xff]  }
  0x5b   : > { %546 = vmatpush1.bf16.msra.mxu1 %v2057_v21  ;;  %v587_v6 = vadd.f32 %v586_v1, %v581_v3  ;;  %v588_v8 = vadd.f32 %v586_v1, %v582_v4  ;;  %v2116_v4 = vld [vmem:[#allocation6 + $0x118] sm:$0xff]  }
  0x5c   : > { %547 = vmatprep.subr.bf16.mxu1 %v2062_v23  ;;  %1863 = vmatpush3.bf16.msra.mxu0 %v2084_v43 }
  0x5d   : > { %1864 = vmatprep.subr.bf16.mxu0 %v2086_v45 }
  0x5f   : > { %548 = vmatpush1.bf16.msra.mxu1 %v2060_v27  ;;  %v2131_v27 = vld [vmem:[#allocation6 + $0x230] sm:$0xff]  }
  0x60   : > { %549 = vmatprep.subr.bf16.mxu1 %v2065_v28  ;;  %1865 = vmatpush3.bf16.msra.mxu0 %v2088_v47  ;;  %v2111_v28 = vld [vmem:[#allocation6 + $0x1e0] sm:$0xff]  }
  0x61   : > { %1866 = vmatprep.subr.bf16.mxu0 %v2090_v49  ;;  %v2491_v49 = vld [vmem:[%s2715_s5] sm:$0xf] }
  0x63   : > { %550 = vmatpush1.bf16.msra.mxu1 %v2063_v31 }
  0x64   : > { %1876 = vmatprep.subr.bf16.mxu1 %v2067_v32  ;;  %1867 = vmatpush3.bf16.msra.mxu0 %v2092_v51  ;;  %v477_v51 = vrot.slane %v2491_v49, %v476_v63 }
  0x65   : > { %1868 = vmatprep.subr.bf16.mxu0 %v2094_v53 }
  0x66   : > { %1750 = vmatmul.mubr.msk.bf16.vlgmr.msra.gmra.mxu1 %vm490_vm0, %v371_v16  ;;  %v654_v16 = vadd.s32 8, %v2435_v60  ;;  %vm682_vm0 = vcmp.lt.s32.totalorder %v2435_v60, 4 }
  0x67   : > { %1877 = vmatpush3.bf16.msra.mxu1 %v2069_v34  ;;  %v580_v34 = vld [vmem:[%s2416_s9 + $0x18] sm:$0xff]  ;;  %s1732_s9 = sshll.u32 %s2413_s11, 4 }
  0x68   : > { %1878 = vmatprep.subr.bf16.mxu1 %v2071_v35  ;;  %1869 = vmatpush3.bf16.msra.mxu0 %v2096_v55  ;;  %v658_v21 = vand.u32 3, %v654_v16  ;;  %v656_v25 = vshra.s32 %v654_v16, 2  ;;  %s365_s15 = scalar_lea.vmem [#allocation8], %s1732_s9 }
  0x69   : > { %1898 = vmatprep.subr.bf16.mxu0 %v2098_v57  ;;  %1553 = vperm.xlu1 %2041, %v580_v34   ;;  %s1621_s18 = sshll.u32 %s365_s15, 4  ;;  %s2667_s18 = int_to_ptr.vmem [resolvable:$true] %s1621_s18 }
  0x6a   : > { %vm2466_vm5 = vcmp.le.s32.totalorder %v658_v21, 2  ;;  %vm2470_vm6 = vcmp.le.s32.totalorder %v656_v25, 2  ;;  %vm2501_vm11 = vcmp.ge.s32.totalorder %v656_v25, 1  ;;  %vm2514_vm14 = vcmp.ge.s32.totalorder %v658_v21, 1  ;;  %s2194_s22 = scalar_lea.vmem %s2667_s18, 256  ;;  %p2201_p2 = scmp.lt.s32.totalorder %s2667_s18, %s2199_s29 }
  0x6b   : > { %1879 = vmatpush3.bf16.msra.mxu1 %v2073_v36  ;;  %vm741_vm8 = vmand %vm2470_vm6, %vm2466_vm5  ;;  %p2195_p0 = scmp.ne.s32.totalorder %s2667_s18, %s2194_s22  ;;  %p2202_p3 = scmp.lt.s32.totalorder %s2200_s17, %s2194_s22 }
  0x6c   : > { %1880 = vmatprep.subr.bf16.mxu1 %v2075_v37  ;;  %vm2482_vm9 = vmpackc.low %vm741_vm8, %vm740_vm7  ;;  %vm693_vm8 = vcmp.lt.s32.totalorder %v2435_v60, 3 }
  0x6d   : > { %vm672_vm7 = vmand %vm2497_vm10, %vm2506_vm12  ;;  %p2196_p9 = pnand %p2195_p0, %p2752_p1  ;;  %p2203_p7 = por %p2202_p3, %p2201_p2 }
  0x6e   : > { %vm673_vm15 = vmand %vm2501_vm11, %vm2514_vm14 }
  0x6f   : > { %1881 = vmatpush3.bf16.msra.mxu1 %v2077_v38  ;;  %vm1829_vm13 = vmpackc.low %vm2514_vm14, %vm2506_vm12  ;;  %p2197_p13 = pneg %p2196_p9 }
  0x70   : > { %1882 = vmatprep.subr.bf16.mxu1 %v2079_v39 }
  0x71   : > { %p2204_p4 = pnand %p2203_p7, %p2197_p13 }
  0x73   : > { %1883 = vmatpush3.bf16.msra.mxu1 %v2081_v40 }
  0x74   : > { %1884 = vmatprep.subr.bf16.mxu1 %v2083_v42 }
  0x77   : > { %1885 = vmatpush3.bf16.msra.mxu1 %v2085_v44 }
  0x78   : > { %1886 = vmatprep.subr.bf16.mxu1 %v2087_v46 }
  0x7b   : > { %1887 = vmatpush3.bf16.msra.mxu1 %v2089_v48 }
  0x7c   : > { %1888 = vmatprep.subr.bf16.mxu1 %v2091_v50  ;;  %v473_v50 = vrot.slane %v2491_v49, %v2438_v62 }
  0x7f   : > { %1889 = vmatpush3.bf16.msra.mxu1 %v2093_v52 }
  0x80   : > { %1890 = vmatprep.subr.bf16.mxu1 %v2095_v54 }
  0x83   : > { %1891 = vmatpush3.bf16.msra.mxu1 %v2097_v56 }
  0x84   : > { %1920 = vmatprep.subr.bf16.mxu1 %v2099_v58 }
  0xc2   : > { %v596_v61 = vpop.permute.xlu0 %595 }
  0xc3   : > { %v603_v7 = vmul.f32 %v596_v61, %v592_v2 }
  0xc5   : > { %v605_v10 = vadd.f32 %v603_v7, %v587_v6 }
  0xc6   : > { %v601_v5 = vpop.permute.xlu0 %600 }
  0xc7   : > { %v604_v9 = vmul.f32 %v601_v5, %v592_v2  ;;  %v609_v12 = vmul.f32 0.2, %v605_v10  ;;  %vm607_vm1 = vcmp.ge.f32.partialorder %v605_v10, 0.0 }
  0xc9   : > { %v606_v11 = vadd.f32 %v604_v9, %v588_v8  ;;  %v611_v14 = vsel %vm607_vm1, %v605_v10, %v609_v12  ;;  %vm706_vm1 = vcmp.lt.s32.totalorder %v2435_v60, 1  ;;  %v2133_v10 = vld [vmem:[#allocation6 + $0x220] sm:$0xff]  }
  0xca   : > { %v621_v17 = vmul.f32 %v611_v14, %v611_v14 }
  0xcb   : > { %v610_v13 = vmul.f32 0.2, %v606_v11  ;;  %vm608_vm2 = vcmp.ge.f32.partialorder %v606_v11, 0.0 }
  0xcd   : > { %v612_v15 = vsel %vm608_vm2, %v606_v11, %v610_v13  ;;  %vm669_vm2 = vcmp.lt.s32.totalorder %v2435_v60, 5 }
  0xce   : > { %v613_v18 = vadd.f32 %v612_v15, %v611_v14  ;;  %v622_v19 = vmul.f32 %v612_v15, %v612_v15 }
  0xd0   : > { %v614_v23 = vrot.slane %v613_v18, 4  ;;  %v623_v24 = vadd.f32 %v622_v19, %v621_v17 }
  0xd2   : > { %v615_v30 = vadd.f32 %v614_v23, %v613_v18  ;;  %v624_v31 = vrot.slane %v623_v24, 4 }
  0xd4   : > { %v616_v35 = vrot.slane %v615_v30, 2  ;;  %v625_v36 = vadd.f32 %v624_v31, %v623_v24 }
  0xd6   : > { %v617_v37 = vadd.f32 %v616_v35, %v615_v30  ;;  %v626_v38 = vrot.slane %v625_v36, 2 }
  0xd8   : > { %v618_v39 = vrot.slane %v617_v37, 1  ;;  %v627_v40 = vadd.f32 %v626_v38, %v625_v36  ;;  %v2101_v38 = vld [vmem:[#allocation6 + $0x1b8] sm:$0xff]  }
  0xda   : > { %v628_v41 = vrot.slane %v627_v40, 1  ;;  %v619_v42 = vadd.f32 %v618_v39, %v617_v37  ;;  %v2100_v37 = vld [vmem:[#allocation6 + $0x138] sm:$0xff]  }
  0xdc   : > { %v629_v43 = vadd.f32 %v628_v41, %v627_v40  ;;  %v620_v44 = vmul.f32 0.0625, %v619_v42 }
  0xde   : > { %v630_v45 = vmul.f32 0.0625, %v629_v43  ;;  %v631_v46 = vmul.f32 %v620_v44, %v620_v44  ;;  %v633_v54 = vsub.f32 %v611_v14, %v620_v44  ;;  %v634_v55 = vsub.f32 %v612_v15, %v620_v44  ;;  %v2102_v43 = vld [vmem:[#allocation6 + $0x170] sm:$0xff]  }
  0xdf   : > { %v2103_v44 = vld [vmem:[#allocation6 + $0x1f0] sm:$0xff]  }
  0xe0   : > { %v632_v47 = vsub.f32 %v630_v45, %v631_v46 }
  0xe2   : > { %v635_v48 = vadd.f32 1e-05, %v632_v47 }
  0xe4   : > { %2138 = vrsqrt.f32 %v635_v48 }
  0xf1   : > { %v2139_v56 = vpop.eup %2138 }
  0xf2   : > { %v637_v1 = vmul.f32 %v2139_v56, %v633_v54  ;;  %v638_v2 = vmul.f32 %v2139_v56, %v634_v55  ;;  %v2107_v54 = vld [vmem:[#allocation6 + $0x1e8] sm:$0xff]  }
  0xf3   : > { %v2108_v55 = vld [vmem:[#allocation6 + $0x128] sm:$0xff]  }
  0xf4   : > { %v2109_v56 = vld [vmem:[#allocation6 + $0x1a8] sm:$0xff]  }
 0x116   : > { %v528_v52 = vpop.f32.mrf.mxu1 }
 0x117   : > { %v529_v53 = vadd.f32 %v528_v52, %v473_v50  ;;  %v2105_v52 = vld [vmem:[#allocation6 + $0x1b0] sm:$0xff]  }
 0x118   : > { %v530_v57 = vpop.f32.mrf.mxu1 }
 0x119   : > { %v639_v58 = vadd.f32 1.0, %v529_v53  ;;  %v531_v59 = vadd.f32 %v530_v57, %v477_v51  ;;  %v2104_v51 = vld [vmem:[#allocation6 + $0x130] sm:$0xff]   ;;  %v2106_v53 = vld [vmem:[#allocation6 + $0x168] sm:$0xff]  }
 0x11a   : > { %v532_v61 = vpop.f32.mrf.mxu1 }
 0x11b   : > { %v643_v3 = vrot.slane %v639_v58, %v2438_v62  ;;  %v649_v8 = vrot.slane %v531_v59, %v2438_v62  ;;  %v2112_v58 = vld [vmem:[#allocation6 + $0x120] sm:$0xff]  }
 0x11c   : > { %v533_v5 = vpop.f32.mrf.mxu1  ;;  %v2113_v59 = vld [vmem:[#allocation6 + $0x1a0] sm:$0xff]  }
 0x11d   : > { %v644_v6 = vmul.f32 %v643_v3, %v637_v1  ;;  %v645_v7 = vmul.f32 %v643_v3, %v638_v2  ;;  %v2114_v1 = vld [vmem:[#allocation6 + $0x158] sm:$0xff]  }
 0x11e   : > { %v2115_v2 = vld [vmem:[#allocation6 + $0x1d8] sm:$0xff]  }
 0x11f   : > { %v2518_v11 = vadd.f32 %v649_v8, %v644_v6  ;;  %v2520_v12 = vadd.f32 %v649_v8, %v645_v7  ;;  %v2117_v5 = vld [vmem:[#allocation6 + $0x198] sm:$0xff]   ;;  %v2118_v6 = vld [vmem:[#allocation6 + $0x150] sm:$0xff]  }
 0x120   : > { %v2119_v7 = vld [vmem:[#allocation6 + $0x1d0] sm:$0xff]  }
 0x121   : > { %v680_v13 = vrot.slane %v2518_v11, 4  ;;  %v681_v14 = vrot.slane %v2520_v12, 4  ;;  %v704_v15 = vrot.slane %v2518_v11, 7  ;;  %v705_v16 = vrot.slane %v2520_v12, 7  ;;  %v2120_v8 = vld [vmem:[#allocation6 + $0x110] sm:$0xff]  }
 0x122   : > { %v667_v17 = vrot.slane %v2518_v11, 3  ;;  %v668_v18 = vrot.slane %v2520_v12, 3  ;;  %v691_v19 = vrot.slane %v2518_v11, 5  ;;  %v692_v20 = vrot.slane %v2520_v12, 5 }
 0x123   : > { %v683_v21 = vsel %vm682_vm0, %v680_v13, %v681_v14  ;;  %v684_v22 = vsel %vm682_vm0, %v681_v14, %v680_v13  ;;  %v707_v23 = vsel %vm706_vm1, %v704_v15, %v705_v16  ;;  %v708_v24 = vsel %vm706_vm1, %v705_v16, %v704_v15  ;;  %vm2571_vm0 = vmpackc.low %vm673_vm15, %vm672_vm7  ;;  %v2121_v13 = vld [vmem:[#allocation6 + $0x190] sm:$0xff]   ;;  %v2122_v14 = vld [vmem:[#allocation6 + $0x148] sm:$0xff]  }
 0x124   : > { %v1824_v25 = vpack.c.bf16 %v683_v21, %v684_v22  ;;  %v1830_v30 = vpack.c.bf16 %v707_v23, %v708_v24  ;;  %v2564_v31 = vsel %vm669_vm2, %v667_v17, %v668_v18  ;;  %vm717_vm1 = vcmp.lt.s32.totalorder %v2435_v60, 7  ;;  %vm2749_vm15 = vmand %vm2497_vm10, %vm2458_vm3  ;;  %v2123_v15 = vld [vmem:[#allocation6 + $0x1c8] sm:$0xff]  }
 0x125   : > { %v2578_v34 = vsel %vm669_vm2, %v668_v18, %v667_v17  ;;  %v2582_v35 = vsel %vm693_vm8, %v691_v19, %v692_v20  ;;  %v2586_v36 = vsel %vm693_vm8, %v692_v20, %v691_v19  ;;  %vm2750_vm7 = vmand %vm2501_vm11, %vm2466_vm5  ;;  %v715_v39 = vrot.slane %v2518_v11, 1  ;;  %v2124_v16 = vld [vmem:[#allocation6 + $0x108] sm:$0xff]   ;;  %v2126_v18 = vld [vmem:[#allocation6 + $0x140] sm:$0xff]  }
 0x126   : > { %vm1832_vm2 = vmpackc.low %vm2750_vm7, %vm2749_vm15  ;;  %1831 = vmatprep.mubr.msk.bf16.mxu1 %vm1829_vm13, %v1830_v30  ;;  %v1827_v40 = vpack.c.bf16 %v2564_v31, %v2578_v34  ;;  %v1833_v41 = vpack.c.bf16 %v2582_v35, %v2586_v36  ;;  %v716_v42 = vrot.slane %v2520_v12, 1  ;;  %v1845_v45 = vpack.c.bf16 %v2586_v36, %v2582_v35  ;;  %v2625_v57 = vpop.f32.mrf.mxu1  ;;  %v2125_v17 = vld [vmem:[#allocation6 + $0x188] sm:$0xff]   ;;  %v2127_v19 = vld [vmem:[#allocation6 + $0x1c0] sm:$0xff]  }
 0x127   : > { %vm2751_vm8 = vmpackc.low %vm2501_vm11, %vm2497_vm10  ;;  %v1839_v46 = vpack.c.bf16 %v684_v22, %v683_v21  ;;  %v2128_v20 = vld [vmem:[#allocation6 + $0x100] sm:$0xff]   ;;  %v2130_v22 = vld [vmem:[#allocation6 + $0x238] sm:$0xff]   ;;  %v1842_v23 = vpack.c.bf16 %v2578_v34, %v2564_v31  ;;  %v752_v9 = vpack.c.bf16 %v2520_v12, %v2518_v11  ;;  %v2271_v24 = vmov 0.0  }
 0x128   : > { %1825 = vmatprep.mubr.msk.bf16.mxu0 %vm2751_vm8, %v1824_v25  ;;  %vm1838_vm15 = vmpackc.low %vm2470_vm6, %vm2462_vm4  ;;  %1834 = vmatmul.mubr.msk.bf16.vlgmr.msra.gmra.mxu1 %vm1832_vm2, %v1833_v41  ;;  %v718_v47 = vsel %vm717_vm1, %v715_v39, %v716_v42  ;;  %v719_v48 = vsel %vm717_vm1, %v716_v42, %v715_v39  ;;  %v2627_v61 = vpop.f32.mrf.mxu1  ;;  %v2129_v21 = vld [vmem:[#allocation6 + $0x180] sm:$0xff]   ;;  %v2134_v25 = vld [vmem:[#allocation6 + $0x218] sm:$0xff]   ;;  %v484_v42 = vsub.s32 3, %v2435_v60 }
 0x129   : > { %1828 = vmatmul.mubr.msk.bf16.vlgmr.msra.gmra.mxu0 %vm2571_vm0, %v1827_v40  ;;  %vm1835_vm10 = vmpackc.low %vm2466_vm5, %vm2458_vm3  ;;  %1921 = vmatpush3.bf16.msra.mxu1 %v2101_v38  ;;  %v1836_v50 = vpack.c.bf16 %v719_v48, %v718_v47  ;;  %v2135_v11 = vld [vmem:[#allocation6 + $0x210] sm:$0xff]   ;;  %v2136_v12 = vld [vmem:[#allocation6 + $0x208] sm:$0xff]  }
 0x12a   : > { %1899 = vmatpush3.bf16.msra.mxu0 %v2100_v37  ;;  %1840 = vmatprep.mubr.msk.bf16.mxu1 %vm1838_vm15, %v1839_v46  ;;  %v573_v3 = vpop.f32.mrf.mxu1  ;;  %vm726_vm3 = vmand %vm2462_vm4, %vm2506_vm12  ;;  %vm2272_vm4 = vmmov 0   ;;  %v2137_v30 = vld [vmem:[#allocation6 + $0x200] sm:$0xff]   ;;  %v904_v46 = vrot.slane %v2444_v0, %v484_v42 }
 0x12b   : > { %1900 = vmatprep.subr.bf16.mxu0 %v2102_v43  ;;  %1837 = vmatprep.mubr.msk.bf16.mxu0 %vm1835_vm10, %v1836_v50  ;;  %vm727_vm5 = vmand %vm2470_vm6, %vm2514_vm14 }
 0x12c   : > { %1922 = vmatprep.subr.bf16.mxu1 %v2103_v44  ;;  %v574_v63 = vpop.f32.mrf.mxu1  ;;  %vm1841_vm11 = vmpackc.low %vm727_vm5, %vm726_vm3 }
 0x12d   : > { %1923 = vmatpush3.bf16.msra.mxu1 %v2105_v52 }
 0x12e   : > { %1901 = vmatpush3.bf16.msra.mxu0 %v2104_v51  ;;  %1924 = vmatprep.subr.bf16.mxu1 %v2107_v54 }
 0x12f   : > { %1902 = vmatprep.subr.bf16.mxu0 %v2106_v53  ;;  %v480_v53 = vsub.s32 2, %v2435_v60 }
 0x131   : > { %1925 = vmatpush3.bf16.msra.mxu1 %v2109_v56 }
 0x132   : > { %1903 = vmatpush3.bf16.msra.mxu0 %v2108_v55  ;;  %1926 = vmatprep.subr.bf16.mxu1 %v2111_v28 }
 0x133   : > { %1904 = vmatprep.subr.bf16.mxu0 %v2110_v26 }
 0x135   : > { %1927 = vmatpush3.bf16.msra.mxu1 %v2113_v59  ;;  %v1545_v59 = vrot.slane %v2444_v0, %v480_v53 }
 0x136   : > { %1905 = vmatpush3.bf16.msra.mxu0 %v2112_v58  ;;  %1928 = vmatprep.subr.bf16.mxu1 %v2115_v2 }
 0x137   : > { %1906 = vmatprep.subr.bf16.mxu0 %v2114_v1  ;;  %v1549_v1 = vpop.permute.xlu1 %1548 }
 0x138   : > { %v1556_v63 = vmul.f32 %v1549_v1, %v1545_v59 }
 0x139   : > { %1929 = vmatpush3.bf16.msra.mxu1 %v2117_v5 }
 0x13a   : > { %1907 = vmatpush3.bf16.msra.mxu0 %v2116_v4  ;;  %1930 = vmatprep.subr.bf16.mxu1 %v2119_v7 }
 0x13b   : > { %1908 = vmatprep.subr.bf16.mxu0 %v2118_v6 }
 0x13d   : > { %1931 = vmatpush3.bf16.msra.mxu1 %v2121_v13 }
 0x13e   : > { %1909 = vmatpush3.bf16.msra.mxu0 %v2120_v8  ;;  %1932 = vmatprep.subr.bf16.mxu1 %v2123_v15 }
 0x13f   : > { %1910 = vmatprep.subr.bf16.mxu0 %v2122_v14  ;;  %v1554_v14 = vpop.permute.xlu1 %1553 }
 0x141   : > { %1933 = vmatpush3.bf16.msra.mxu1 %v2125_v17 }
 0x142   : > { %1911 = vmatpush3.bf16.msra.mxu0 %v2124_v16  ;;  %1934 = vmatprep.subr.bf16.mxu1 %v2127_v19  ;;  %v1557_v19 = vmul.f32 %v1554_v14, %v1545_v59 }
 0x143   : > { %1912 = vmatprep.subr.bf16.mxu0 %v2126_v18 }
 0x145   : > { %1935 = vmatpush3.bf16.msra.mxu1 %v2129_v21 }
 0x146   : > { %1913 = vmatpush3.bf16.msra.mxu0 %v2128_v20 }
 0x147   : > { %1951 = vmatprep.subr.bf16.mxu0 %v2271_v24 }
 0x148   : > { %1843 = vmatmul.mubr.msk.bf16.vlgmr.msra.gmra.mxu1 %vm1841_vm11, %v1842_v23 }
 0x149   : > { %1452 = vmatmul.mubr.bf16.vlgmr.msra.gmra.mxu0 %v752_v9 }
 0x14a   : > { %1952 = vmatpush3.bf16.msra.mxu0 %v2130_v22  ;;  %1967 = vmatprep.mubr.msk.bf16.mxu0 %vm2272_vm4, %v2271_v24 }
 0x14b   : > { %1953 = vmatprep.subr.bf16.mxu0 %v2271_v24 }
 0x14e   : > { %1954 = vmatpush3.bf16.msra.mxu0 %v2131_v27 }
 0x14f   : > { %1955 = vmatprep.subr.bf16.mxu0 %v2271_v24 }
 0x152   : > { %1956 = vmatpush3.bf16.msra.mxu0 %v2132_v29 }
 0x153   : > { %1957 = vmatprep.subr.bf16.mxu0 %v2271_v24 }
 0x156   : > { %1958 = vmatpush3.bf16.msra.mxu0 %v2133_v10 }
 0x157   : > { %1959 = vmatprep.subr.bf16.mxu0 %v2271_v24 }
 0x15a   : > { %1960 = vmatpush3.bf16.msra.mxu0 %v2134_v25 }
 0x15b   : > { %1961 = vmatprep.subr.bf16.mxu0 %v2271_v24 }
 0x15e   : > { %1962 = vmatpush3.bf16.msra.mxu0 %v2135_v11 }
 0x15f   : > { %1963 = vmatprep.subr.bf16.mxu0 %v2271_v24 }
 0x162   : > { %1964 = vmatpush3.bf16.msra.mxu0 %v2136_v12 }
 0x163   : > { %1965 = vmatprep.subr.bf16.mxu0 %v2271_v24 }
 0x166   : > { %1966 = vmatpush3.bf16.msra.mxu0 %v2137_v30 }
 0x169   : > { %1968 = vmatmul.mubr.msk.bf16.vlgmr.msra.gmra.mxu0 %vm2482_vm9, %v1845_v45 }
 0x1e8   : > { %v1892_v34 = vpop.f32.mrf.mxu1 }
 0x1e9   : > { %v1870_v31 = vpop.f32.mrf.mxu0 }
 0x1ea   : > { %v1893_v38 = vpop.f32.mrf.mxu1 }
 0x1eb   : > { %v1871_v33 = vpop.f32.mrf.mxu0  ;;  %v1894_v50 = vadd.f32 %v1893_v38, %v1892_v34 }
 0x1ec   : > { %v1895_v40 = vpop.f32.mrf.mxu1  ;;  %v1872_v35 = vadd.f32 %v1871_v33, %v1870_v31 }
 0x1ed   : > { %v1873_v37 = vpop.f32.mrf.mxu0 }
 0x1ee   : > { %v1896_v43 = vpop.f32.mrf.mxu1  ;;  %v1372_v45 = vadd.f32 %v1872_v35, %v904_v46 }
 0x1ef   : > { %v1874_v39 = vpop.f32.mrf.mxu0  ;;  %v1897_v26 = vadd.f32 %v1896_v43, %v1895_v40 }
 0x1f0   : > { %v1875_v47 = vadd.f32 %v1874_v39, %v1873_v37  ;;  %v1413_v54 = vadd.f32 %v1894_v50, %v1372_v45  ;;  %v481_v45 = vrot.slane %v2491_v49, %v480_v53 }
 0x1f2   : > { %v1375_v55 = vadd.f32 %v1875_v47, %v904_v46  ;;  %v570_v47 = vadd.f32 %v2625_v57, %v481_v45 }
 0x1f4   : > { %v1416_v2 = vadd.f32 %v1897_v26, %v1375_v55  ;;  %v1592_v50 = vadd.f32 1.0, %v570_v47 }
 0x208   : > { %v1936_v36 = vpop.f32.mrf.mxu1 }
 0x209   : > { %v1914_v41 = vpop.f32.mrf.mxu0 }
 0x20a   : > { %v1937_v48 = vpop.f32.mrf.mxu1 }
 0x20b   : > { %v1915_v44 = vpop.f32.mrf.mxu0  ;;  %v1938_v3 = vadd.f32 %v1937_v48, %v1936_v36  ;;  %v485_v48 = vrot.slane %v2491_v49, %v484_v42 }
 0x20c   : > { %v1916_v51 = vadd.f32 %v1915_v44, %v1914_v41  ;;  %v1939_v56 = vpop.f32.mrf.mxu1 }
 0x20d   : > { %v1917_v32 = vpop.f32.mrf.mxu0 }
 0x20e   : > { %v1454_v28 = vadd.f32 %v1916_v51, %v1413_v54  ;;  %v1940_v4 = vpop.f32.mrf.mxu1  ;;  %v572_v51 = vadd.f32 %v2627_v61, %v485_v48 }
 0x20f   : > { %v1918_v52 = vpop.f32.mrf.mxu0  ;;  %v1941_v8 = vadd.f32 %v1940_v4, %v1939_v56  ;;  %v1596_v56 = vrot.slane %v1592_v50, %v2438_v62 }
 0x210   : > { %v1919_v58 = vadd.f32 %v1918_v52, %v1917_v32  ;;  %v1495_v6 = vadd.f32 %v1938_v3, %v1454_v28  ;;  %v1602_v60 = vrot.slane %v572_v51, %v2438_v62 }
 0x212   : > { %v1457_v5 = vadd.f32 %v1919_v58, %v1416_v2 }
 0x214   : > { %v1498_v17 = vadd.f32 %v1941_v8, %v1457_v5 }
 0x229   : > { %v1535_v7 = vpop.f32.mrf.mxu0 }
 0x22a   : > { %v1536_v13 = vadd.f32 %v1535_v7, %v1495_v6 }
 0x22b   : > { %v1969_v15 = vpop.f32.mrf.mxu0 }
 0x22c   : > { %v1558_v16 = vadd.f32 %v1556_v63, %v1536_v13 }
 0x22d   : > { %v1538_v18 = vpop.f32.mrf.mxu0 }
 0x22e   : > { %v1562_v20 = vmul.f32 0.2, %v1558_v16  ;;  %v1539_v21 = vadd.f32 %v1538_v18, %v1498_v17  ;;  %vm1560_vm6 = vcmp.ge.f32.partialorder %v1558_v16, 0.0 }
 0x22f   : > { %v1970_v0 = vpop.f32.mrf.mxu0 }
 0x230   : > { %v1559_v22 = vadd.f32 %v1557_v19, %v1539_v21  ;;  %v1564_v23 = vsel %vm1560_vm6, %v1558_v16, %v1562_v20 }
 0x231   : > { %v1574_v27 = vmul.f32 %v1564_v23, %v1564_v23 }
 0x232   : > { %vm1561_vm9 = vcmp.ge.f32.partialorder %v1559_v22, 0.0  ;;  %v1563_v9 = vmul.f32 0.2, %v1559_v22 }
 0x234   : > { %v1565_v24 = vsel %vm1561_vm9, %v1559_v22, %v1563_v9 }
 0x235   : > { %v1566_v29 = vadd.f32 %v1565_v24, %v1564_v23  ;;  %v1575_v10 = vmul.f32 %v1565_v24, %v1565_v24 }
 0x237   : > { %v1567_v25 = vrot.slane %v1566_v29, 4  ;;  %v1576_v11 = vadd.f32 %v1575_v10, %v1574_v27 }
 0x239   : > { %v1568_v12 = vadd.f32 %v1567_v25, %v1566_v29  ;;  %v1577_v30 = vrot.slane %v1576_v11, 4 }
 0x23b   : > { %v1569_v31 = vrot.slane %v1568_v12, 2  ;;  %v1578_v33 = vadd.f32 %v1577_v30, %v1576_v11 }
 0x23d   : > { %v1570_v34 = vadd.f32 %v1569_v31, %v1568_v12  ;;  %v1579_v37 = vrot.slane %v1578_v33, 2 }
 0x23f   : > { %v1571_v38 = vrot.slane %v1570_v34, 1  ;;  %v1580_v39 = vadd.f32 %v1579_v37, %v1578_v33 }
 0x241   : > { %v1572_v40 = vadd.f32 %v1571_v38, %v1570_v34  ;;  %v1581_v41 = vrot.slane %v1580_v39, 1 }
 0x243   : > { %v1573_v43 = vmul.f32 0.0625, %v1572_v40  ;;  %v1582_v44 = vadd.f32 %v1581_v41, %v1580_v39 }
 0x245   : > { %v1583_v46 = vmul.f32 0.0625, %v1582_v44  ;;  %v1584_v35 = vmul.f32 %v1573_v43, %v1573_v43  ;;  %v1586_v52 = vsub.f32 %v1564_v23, %v1573_v43  ;;  %v1587_v54 = vsub.f32 %v1565_v24, %v1573_v43 }
 0x247   : > { %v1585_v36 = vsub.f32 %v1583_v46, %v1584_v35 }
 0x249   : > { %v1588_v32 = vadd.f32 1e-05, %v1585_v36 }
 0x24b   : > { %2140 = vrsqrt.f32 %v1588_v32 }
 0x258   : > { %v2141_v55 = vpop.eup %2140 }
 0x259   : > { %v1590_v26 = vmul.f32 %v2141_v55, %v1586_v52  ;;  %v1591_v28 = vmul.f32 %v2141_v55, %v1587_v54 }
 0x25b   : > { %v1598_v57 = vmul.f32 %v1596_v56, %v1591_v28  ;;  %v1597_v49 = vmul.f32 %v1596_v56, %v1590_v26 }
 0x25d   : > { %v1604_v61 = vadd.f32 %v1602_v60, %v1598_v57  ;;  %v1603_v42 = vadd.f32 %v1602_v60, %v1597_v49 }
 0x25f   : > { %1605 = vst [vmem:[%s365_s15] sm:$0xff] %v1603_v42  ;;  %1606 = vst [vmem:[%s365_s15 + $0x8] sm:$0xff] %v1604_v61 }
 0x260   : > { %2207 = shalt.err (!%p2204_p4)
}
 0x261   : > { %s2208_s19 = scalar_lea.hbm %s2665_s21, 256  ;;  %s2212_s14 = scalar_lea.hbm %s2717_s7, 512 }
 0x262   : > { %p2209_p5 = scmp.ne.s32.totalorder %s2665_s21, %s2208_s19  ;;  %p2213_p11 = scmp.lt.s32.totalorder %s2665_s21, %s2717_s7 }
 0x263   : > { %p2214_p12 = scmp.lt.s32.totalorder %s2212_s14, %s2208_s19 }
 0x264   : > { %p2210_p6 = pnand %p2209_p5, %p2752_p1 }
 0x265   : > { %p2215_p0 = por %p2214_p12, %p2213_p11 }
 0x266   : > { %p2211_p10 = pneg %p2210_p6 }
 0x268   : > { %p2216_p9 = pnand %p2215_p0, %p2211_p10 }
 0x26a   : > { %2219 = shalt.err (!%p2216_p9)
}
 0x26b   : > { %s2274_s16 = smov 128   ;;  %s2275_s22 = smov 8  }
 0x26c   : > { %1979 = dma.vmem_to_hbm [thread:$0]  (%p2752_p1), %s2667_s18, 256, %s2665_s21, %s1608_s28, %s2274_s16, %s2274_s16, %s2275_s22  }
 0x26d PF: > { %s1636_s23 = sand.u32 1, %s2250_s24   ;;  %p2753_p13 = scmp.ne.s32.totalorder %s2722_s13, 0 }
 0x26e   : > { %s1637_s29 = scalar_lea.sflag [#allocation5], %s1636_s23 }
 0x26f   : > { %p1989_p2 = pnand %p1724_p8, %p2753_p13 }
 0x271   : > { %p1990_p3 = pneg %p1989_p2 }
 0x273   : > { %2245 = dma.done.wait (%p1990_p3), %s1637_s29, 256  }
 0x274   : > { %2247 = vsyncadd (%p1990_p3), %s1637_s29, 4294967040  ;;  %p19_p7 = scmp.ge.s32.totalorder %s2341_s30, 4   ;;  %s2754_s24 = smov %s2254_s25 }
 0x275   : > { %s2755_s25 = smov %s2258_s26  ;;  %s2756_s26 = smov %s2353_s10 }
 0x276   : > { %s2757_s27 = smov %s2341_s30  ;;  %21 = sbr.rel (!%p19_p7) target bundleno = 5 (0x5), region = 138 }
 0x27b   :  { %1642 = vsyncpa [#allocation4], 1 }
 0x27c   :  { %1644 = vsyncpa [#allocation4 + $0x1], 1 }
 0x27d   :  { %1645 = vsyncpa [#allocation7], 1 }
 0x27e   :  { %1646 = vsyncpa [#allocation5], 1 }
 0x27f   :  { %1648 = vsyncpa [#allocation5 + $0x1], 1 }

</bundles_post_ra>
